<compile_context>
chip_gen: v7x
topology: tpu7x:2x2x1
jax: 0.10.0
libtpu: 0.0.40
codegen_flags: <defaults>
</compile_context>

<pallas_src>
import functools

import jax
import jax.numpy as jnp
import numpy as np
from jax import lax
from jax.experimental import pallas as pl
from jax.experimental.pallas import tpu as pltpu

LN_EPS = 1e-12  # FNet config default layer_norm_eps


# ----------------------------- math helpers ---------------------------------
def _layernorm(v, g, b, eps=LN_EPS):
    mu = jnp.mean(v, axis=-1, keepdims=True)
    var = jnp.mean(jnp.square(v - mu), axis=-1, keepdims=True)
    return (v - mu) * jax.lax.rsqrt(var + eps) * g + b


def _gelu_new(x):
    # ACT2FN["gelu_new"]: tanh approximation of GELU (dtype-preserving).
    return 0.5 * x * (1.0 + jnp.tanh(0.7978845608028654
                                     * (x + 0.044715 * x * x * x)))


# ----------------------------- kernel ----------------------------------------
def fnet_layer_kernel(x_ref, csss_ref, ch_ref, sh_ref,
                      ln1g_ref, ln1b_ref, w1_ref, b1_ref,
                      w2_ref, b2_ref, ln2g_ref, ln2b_ref, o_ref,
                      *, ffn_chunk, num_chunks, ew_dtype):
    S = x_ref.shape[1]
    H = x_ref.shape[2]
    x = x_ref[0].astype(jnp.float32)            # (S, H) f32
    xb = x.astype(jnp.bfloat16)                 # bf16 operand for the MXU

    # ---- Fourier mixing: Re( Cs @ X @ Ch  -  Ss @ X @ Sh ) (matrices symmetric)
    # Fused seq-axis DFT: [Cs; Ss] @ X  -> (2S, H), one MXU matmul.
    u = jnp.dot(csss_ref[...], xb, preferred_element_type=jnp.float32)
    u_bf = u.astype(jnp.bfloat16)               # cast once, then slice
    ur = u_bf[:S]
    ui = u_bf[S:]
    # Hidden-axis DFT, real part only (Ch/Sh symmetric -> no RHS transpose).
    four = (jnp.dot(ur, ch_ref[...], preferred_element_type=jnp.float32)
            - jnp.dot(ui, sh_ref[...], preferred_element_type=jnp.float32))

    # ---- residual + LayerNorm (FNetBasicOutput), f32 ----
    y = _layernorm(four + x, ln1g_ref[...], ln1b_ref[...])
    yb = y.astype(jnp.bfloat16)

    # ---- FFN: dense -> gelu_new -> dense, tiled over the intermediate dim ----
    def ffn_chunk_fn(ci, acc):
        start = pl.multiple_of(ci * ffn_chunk, ffn_chunk)
        w1c = w1_ref[:, pl.ds(start, ffn_chunk)]
        b1c = b1_ref[:, pl.ds(start, ffn_chunk)]
        hc = jnp.dot(yb, w1c, preferred_element_type=jnp.float32) + b1c
        hc = _gelu_new(hc.astype(ew_dtype))      # bf16 on v6e/v7x, f32 on v5e
        w2c = w2_ref[pl.ds(start, ffn_chunk), :]
        return acc + jnp.dot(hc.astype(jnp.bfloat16), w2c,
                             preferred_element_type=jnp.float32)

    if num_chunks == 1:
        h = jnp.dot(yb, w1_ref[...], preferred_element_type=jnp.float32) + b1_ref[...]
        h = _gelu_new(h.astype(ew_dtype))
        out = jnp.dot(h.astype(jnp.bfloat16), w2_ref[...],
                      preferred_element_type=jnp.float32)
    else:
        out = lax.fori_loop(0, num_chunks, ffn_chunk_fn,
                            jnp.zeros((S, H), jnp.float32), unroll=True)
    out = out + b2_ref[...]

    # dropout is identity in eval mode
    z = _layernorm(out + y, ln2g_ref[...], ln2b_ref[...])
    o_ref[0] = z.astype(o_ref.dtype)


# ----------------------------- wrapper helpers --------------------------------
def _resident_spec(arr):
    """Full-array block, constant index_map, single-buffered (never re-fetched)."""
    nd = arr.ndim
    idx = lambda b: (0,) * nd
    try:
        return pl.BlockSpec(arr.shape, idx, pipeline_mode=pl.Buffered(1))
    except TypeError:  # older jax without pipeline_mode kwarg
        return pl.BlockSpec(arr.shape, idx)


def _bf16_elementwise_ok():
    """bf16 VPU/EUP exists on v6e/v7x only; keep elementwise math f32 elsewhere."""
    try:
        kind = jax.devices()[0].device_kind.lower()
    except Exception:
        return False
    return ("v6" in kind) or ("v7" in kind)


def _vmem_limit_bytes():
    """Generation-aware scoped-VMEM limit (leave headroom on 64-MiB-VMEM chips)."""
    cap = None
    try:
        cap = int(pltpu.get_tpu_info().vmem_capacity_bytes)
    except Exception:
        cap = None
    if cap is not None and cap <= 64 * 1024 * 1024:
        return 40 * 1024 * 1024      # v7x-class: 64 MiB/TC physical
    return 48 * 1024 * 1024          # v5e/v6e: 128 MiB physical


def _pick_ffn_chunk(intermediate, target=512):
    """Largest divisor of I that is a multiple of 128 and <= target (else I)."""
    if intermediate <= target:
        return intermediate
    for c in range(target, 127, -128):
        if intermediate % c == 0:
            return c
    return intermediate


# ----------------------------- per-layer pallas_call ---------------------------
def fnet_layer(x, dft, params):
    """One FNetLayer forward. x: (B, S, H) float32; weights pre-cast bf16."""
    B, S, H = x.shape
    csss, ch, sh = dft                      # bf16: (2S,S), (H,H), (H,H)
    w1, w2 = params["w1"], params["w2"]     # bf16, pre-cast at init
    I = w1.shape[1]

    ffn_chunk = _pick_ffn_chunk(I)
    num_chunks = I // ffn_chunk
    ew_dtype = jnp.bfloat16 if _bf16_elementwise_ok() else jnp.float32

    inputs = (x, csss, ch, sh,
              params["ln1_g"], params["ln1_b"], w1, params["b1"],
              w2, params["b2"], params["ln2_g"], params["ln2_b"])

    act_spec = pl.BlockSpec((1, S, H), lambda b: (b, 0, 0))
    in_specs = [act_spec] + [_resident_spec(a) for a in inputs[1:]]

    flops = (2 * B * (2 * S) * S * H        # fused seq-axis DFT
             + 2 * 2 * B * S * H * H        # hidden-axis DFT (re & im)
             + 2 * 2 * B * S * H * I)       # FFN dense x2
    bytes_accessed = (2 * B * S * H * 4                          # x in + out (f32)
                      + (2 * S * S + 2 * H * H + 2 * H * I) * 2  # bf16 DFT + weights
                      + (6 * H + I) * 4)                         # LN params + biases
    cost = pl.CostEstimate(flops=flops,
                           transcendentals=B * S * I,            # tanh in gelu_new
                           bytes_accessed=bytes_accessed)

    kernel = functools.partial(fnet_layer_kernel, ffn_chunk=ffn_chunk,
                               num_chunks=num_chunks, ew_dtype=ew_dtype)

    return pl.pallas_call(
        kernel,
        out_shape=jax.ShapeDtypeStruct(x.shape, x.dtype),
        grid=(B,),
        in_specs=in_specs,
        out_specs=act_spec,
        input_output_aliases={0: 0},        # reuse the hidden-state HBM buffer
        cost_estimate=cost,
        compiler_params=pltpu.CompilerParams(
            dimension_semantics=("parallel",),
            vmem_limit_bytes=_vmem_limit_bytes()),
    )(*inputs)


def fnet_encoder(x, dft, layer_params):
    """FNetEncoder.forward (returns last_hidden_state)."""
    hidden = x
    for p in layer_params:
        hidden = fnet_layer(hidden, dft, p)
    return hidden


# ----------------------------- parameter construction -------------------------
def make_dft_operands(seq_len, hidden):
    """bf16 MXU operands: [Cs; Ss] stacked (2S,S), Ch (H,H), Sh (H,H)."""
    def cs_ss(n):
        idx = np.arange(n, dtype=np.float64)
        ang = (-2.0 * np.pi / n) * np.outer(idx, idx)
        return np.cos(ang).astype(np.float32), np.sin(ang).astype(np.float32)
    cs, ss = cs_ss(seq_len)
    ch, sh = cs_ss(hidden)
    csss = jnp.asarray(np.concatenate([cs, ss], axis=0), dtype=jnp.bfloat16)
    return csss, jnp.asarray(ch, jnp.bfloat16), jnp.asarray(sh, jnp.bfloat16)


def init_layer_params(key, hidden, intermediate):
    k1, k2, k3, k4, k5, k6, k7, k8 = jax.random.split(key, 8)
    scale = 0.02
    return {
        "ln1_g": 1.0 + 0.1 * jax.random.normal(k3, (1, hidden), jnp.float32),
        "ln1_b": 0.1 * jax.random.normal(k4, (1, hidden), jnp.float32),
        # MXU weight operands pre-cast to bf16 once (no per-layer convert in jit).
        "w1": (scale * jax.random.normal(k1, (hidden, intermediate), jnp.float32)
               ).astype(jnp.bfloat16),
        "b1": 0.1 * jax.random.normal(k5, (1, intermediate), jnp.float32),
        "w2": (scale * jax.random.normal(k2, (intermediate, hidden), jnp.float32)
               ).astype(jnp.bfloat16),
        "b2": 0.1 * jax.random.normal(k6, (1, hidden), jnp.float32),
        "ln2_g": 1.0 + 0.1 * jax.random.normal(k7, (1, hidden), jnp.float32),
        "ln2_b": 0.1 * jax.random.normal(k8, (1, hidden), jnp.float32),
    }


# ---------------- pure-JAX references (for correctness checks) ----------------
def ref_layer_matmul(x, dft, p, ew_dtype):
    """Mirrors the kernel math (bf16 MXU operands, f32 accumulation)."""
    csss, ch, sh = dft
    S = x.shape[1]
    xb = x.astype(jnp.bfloat16)
    u = jnp.einsum('ps,bsh->bph', csss, xb, preferred_element_type=jnp.float32)
    u_bf = u.astype(jnp.bfloat16)
    ur = u_bf[:, :S]
    ui = u_bf[:, S:]
    four = (jnp.einsum('bsh,hk->bsk', ur, ch, preferred_element_type=jnp.float32)
            - jnp.einsum('bsh,hk->bsk', ui, sh, preferred_element_type=jnp.float32))
    xf = x.astype(jnp.float32)
    y = _layernorm(four + xf, p["ln1_g"], p["ln1_b"])
    h = jnp.einsum('bsh,hi->bsi', y.astype(jnp.bfloat16), p["w1"],
                   preferred_element_type=jnp.float32) + p["b1"]
    h = _gelu_new(h.astype(ew_dtype))
    out = jnp.einsum('bsi,ih->bsh', h.astype(jnp.bfloat16), p["w2"],
                     preferred_element_type=jnp.float32) + p["b2"]
    return _layernorm(out + y, p["ln2_g"], p["ln2_b"])


def ref_layer_exact(x, p):
    """Exact module semantics: real part of 2-D FFT and f32 matmuls."""
    four = jnp.real(jnp.fft.fftn(x.astype(jnp.complex64), axes=(1, 2))).astype(jnp.float32)
    y = _layernorm(four + x, p["ln1_g"], p["ln1_b"])
    h = _gelu_new(y @ p["w1"].astype(jnp.float32) + p["b1"])
    out = h @ p["w2"].astype(jnp.float32) + p["b2"]
    return _layernorm(out + y, p["ln2_g"], p["ln2_b"])


if __name__ == "__main__":
    B, S, H, I, L = 2, 8, 32, 128, 2   # batch, seq, hidden, intermediate, layers
    # NOTE: perf conclusions require lane-dense shapes (H, I multiples of 128,
    # e.g. FNet-base H=768, I=3072); this toy config is only a correctness check.

    key = jax.random.PRNGKey(0)
    kx, *kls = jax.random.split(key, 1 + L)
    x = jax.random.normal(kx, (B, S, H), jnp.float32)

    dft = make_dft_operands(S, H)
    layer_params = [init_layer_params(k, H, I) for k in kls]

    out = jax.jit(fnet_encoder)(x, dft, layer_params)
    out = jax.block_until_ready(out)
    out_np = np.asarray(out)

    # Tight check vs. a reference that mirrors the kernel's bf16/f32 math.
    ew = jnp.bfloat16 if _bf16_elementwise_ok() else jnp.float32
    ref_m = x
    for p in layer_params:
        ref_m = ref_layer_matmul(ref_m, dft, p, ew)
    np.testing.assert_allclose(out_np, np.asarray(ref_m), rtol=2e-3, atol=2e-3)

    # Loose semantic check vs. the exact f32 FFT-based FNet layer.
    ref_e = x
    for p in layer_params:
        ref_e = ref_layer_exact(ref_e, p)
    np.testing.assert_allclose(out_np, np.asarray(ref_e), rtol=1e-1, atol=1e-1)

    print("KERNEL_OK")
</pallas_src>

<mosaic_0001>
module attributes {stable_mosaic.version = 11 : i64} {
  func.func @fnet_layer_kernel(%arg0: i32, %arg1: memref<1x8x32xf32, #tpu.memory_space<vmem>>, %arg2: memref<16x8xbf16, #tpu.memory_space<vmem>>, %arg3: memref<32x32xbf16, #tpu.memory_space<vmem>>, %arg4: memref<32x32xbf16, #tpu.memory_space<vmem>>, %arg5: memref<1x32xf32, #tpu.memory_space<vmem>>, %arg6: memref<1x32xf32, #tpu.memory_space<vmem>>, %arg7: memref<32x128xbf16, #tpu.memory_space<vmem>>, %arg8: memref<1x128xf32, #tpu.memory_space<vmem>>, %arg9: memref<128x32xbf16, #tpu.memory_space<vmem>>, %arg10: memref<1x32xf32, #tpu.memory_space<vmem>>, %arg11: memref<1x32xf32, #tpu.memory_space<vmem>>, %arg12: memref<1x32xf32, #tpu.memory_space<vmem>>, %arg13: memref<1x8x32xf32, #tpu.memory_space<vmem>>) attributes {dimension_semantics = [#tpu.dimension_semantics<parallel>], iteration_bounds = array<i64: 2>, scalar_prefetch = 0 : i64, scratch_operands = 0 : i64, tpu.core_type = #tpu.core_type<tc>, window_params = [{transform_indices = @transform_0, window_bounds = array<i64: 1, 8, 32>}, {pipeline_mode = #tpu.pipeline_mode<synchronous>, transform_indices = @transform_1, window_bounds = array<i64: 16, 8>}, {pipeline_mode = #tpu.pipeline_mode<synchronous>, transform_indices = @transform_2, window_bounds = array<i64: 32, 32>}, {pipeline_mode = #tpu.pipeline_mode<synchronous>, transform_indices = @transform_3, window_bounds = array<i64: 32, 32>}, {pipeline_mode = #tpu.pipeline_mode<synchronous>, transform_indices = @transform_4, window_bounds = array<i64: 1, 32>}, {pipeline_mode = #tpu.pipeline_mode<synchronous>, transform_indices = @transform_5, window_bounds = array<i64: 1, 32>}, {pipeline_mode = #tpu.pipeline_mode<synchronous>, transform_indices = @transform_6, window_bounds = array<i64: 32, 128>}, {pipeline_mode = #tpu.pipeline_mode<synchronous>, transform_indices = @transform_7, window_bounds = array<i64: 1, 128>}, {pipeline_mode = #tpu.pipeline_mode<synchronous>, transform_indices = @transform_8, window_bounds = array<i64: 128, 32>}, {pipeline_mode = #tpu.pipeline_mode<synchronous>, transform_indices = @transform_9, window_bounds = array<i64: 1, 32>}, {pipeline_mode = #tpu.pipeline_mode<synchronous>, transform_indices = @transform_10, window_bounds = array<i64: 1, 32>}, {pipeline_mode = #tpu.pipeline_mode<synchronous>, transform_indices = @transform_11, window_bounds = array<i64: 1, 32>}, {transform_indices = @transform_12, window_bounds = array<i64: 1, 8, 32>}]} {
    %c0 = arith.constant 0 : index
    %c0_0 = arith.constant 0 : index
    %c0_1 = arith.constant 0 : index
    %0 = vector.load %arg1[%c0, %c0_0, %c0_1] : memref<1x8x32xf32, #tpu.memory_space<vmem>>, vector<1x8x32xf32>
    %1 = vector.shape_cast %0 : vector<1x8x32xf32> to vector<8x32xf32>
    %2 = arith.truncf %1 : vector<8x32xf32> to vector<8x32xbf16>
    %c0_2 = arith.constant 0 : index
    %c0_3 = arith.constant 0 : index
    %3 = vector.load %arg2[%c0_2, %c0_3] : memref<16x8xbf16, #tpu.memory_space<vmem>>, vector<16x8xbf16>
    %cst = arith.constant dense<0.000000e+00> : vector<16x32xf32>
    %4 = tpu.matmul %3, %2, %cst {dimension_numbers = #tpu.dot_dimension_numbers<[1], [0], [0], [1], [0, 0, 1, 1], [], []>} : vector<16x8xbf16>, vector<8x32xbf16>, vector<16x32xf32> -> vector<16x32xf32>
    %5 = arith.truncf %4 : vector<16x32xf32> to vector<16x32xbf16>
    %6 = vector.extract_strided_slice %5 {offsets = [0, 0], sizes = [8, 32], strides = [1, 1]} : vector<16x32xbf16> to vector<8x32xbf16>
    %7 = vector.extract_strided_slice %5 {offsets = [8, 0], sizes = [8, 32], strides = [1, 1]} : vector<16x32xbf16> to vector<8x32xbf16>
    %c0_4 = arith.constant 0 : index
    %c0_5 = arith.constant 0 : index
    %8 = vector.load %arg3[%c0_4, %c0_5] : memref<32x32xbf16, #tpu.memory_space<vmem>>, vector<32x32xbf16>
    %cst_6 = arith.constant dense<0.000000e+00> : vector<8x32xf32>
    %9 = tpu.matmul %6, %8, %cst_6 {dimension_numbers = #tpu.dot_dimension_numbers<[1], [0], [0], [1], [0, 0, 1, 1], [], []>} : vector<8x32xbf16>, vector<32x32xbf16>, vector<8x32xf32> -> vector<8x32xf32>
    %c0_7 = arith.constant 0 : index
    %c0_8 = arith.constant 0 : index
    %10 = vector.load %arg4[%c0_7, %c0_8] : memref<32x32xbf16, #tpu.memory_space<vmem>>, vector<32x32xbf16>
    %cst_9 = arith.constant dense<0.000000e+00> : vector<8x32xf32>
    %11 = tpu.matmul %7, %10, %cst_9 {dimension_numbers = #tpu.dot_dimension_numbers<[1], [0], [0], [1], [0, 0, 1, 1], [], []>} : vector<8x32xbf16>, vector<32x32xbf16>, vector<8x32xf32> -> vector<8x32xf32>
    %12 = arith.subf %9, %11 : vector<8x32xf32>
    %13 = arith.addf %12, %1 : vector<8x32xf32>
    %c0_10 = arith.constant 0 : index
    %c0_11 = arith.constant 0 : index
    %14 = vector.load %arg5[%c0_10, %c0_11] : memref<1x32xf32, #tpu.memory_space<vmem>>, vector<1x32xf32>
    %c0_12 = arith.constant 0 : index
    %c0_13 = arith.constant 0 : index
    %15 = vector.load %arg6[%c0_12, %c0_13] : memref<1x32xf32, #tpu.memory_space<vmem>>, vector<1x32xf32>
    %cst_14 = arith.constant dense<0.000000e+00> : vector<8xf32>
    %16 = vector.multi_reduction <add>, %13, %cst_14 [1] : vector<8x32xf32> to vector<8xf32>
    %17 = vector.shape_cast %16 : vector<8xf32> to vector<8x1xf32>
    %cst_15 = arith.constant 3.200000e+01 : f32
    %18 = vector.broadcast %cst_15 : f32 to vector<8x1xf32>
    %19 = arith.divf %17, %18 : vector<8x1xf32>
    %20 = vector.broadcast %19 : vector<8x1xf32> to vector<8x32xf32>
    %21 = arith.subf %13, %20 : vector<8x32xf32>
    %22 = arith.mulf %21, %21 : vector<8x32xf32>
    %cst_16 = arith.constant dense<0.000000e+00> : vector<8xf32>
    %23 = vector.multi_reduction <add>, %22, %cst_16 [1] : vector<8x32xf32> to vector<8xf32>
    %24 = vector.shape_cast %23 : vector<8xf32> to vector<8x1xf32>
    %cst_17 = arith.constant 3.200000e+01 : f32
    %25 = vector.broadcast %cst_17 : f32 to vector<8x1xf32>
    %26 = arith.divf %24, %25 : vector<8x1xf32>
    %27 = vector.broadcast %19 : vector<8x1xf32> to vector<8x32xf32>
    %28 = arith.subf %13, %27 : vector<8x32xf32>
    %cst_18 = arith.constant 9.99999996E-13 : f32
    %29 = vector.broadcast %cst_18 : f32 to vector<8x1xf32>
    %30 = arith.addf %26, %29 : vector<8x1xf32>
    %31 = math.rsqrt %30 : vector<8x1xf32>
    %32 = vector.broadcast %31 : vector<8x1xf32> to vector<8x32xf32>
    %33 = arith.mulf %28, %32 : vector<8x32xf32>
    %34 = vector.broadcast %14 : vector<1x32xf32> to vector<8x32xf32>
    %35 = arith.mulf %33, %34 : vector<8x32xf32>
    %36 = vector.broadcast %15 : vector<1x32xf32> to vector<8x32xf32>
    %37 = arith.addf %35, %36 : vector<8x32xf32>
    %38 = arith.truncf %37 : vector<8x32xf32> to vector<8x32xbf16>
    %c0_19 = arith.constant 0 : index
    %c0_20 = arith.constant 0 : index
    %39 = vector.load %arg7[%c0_19, %c0_20] : memref<32x128xbf16, #tpu.memory_space<vmem>>, vector<32x128xbf16>
    %cst_21 = arith.constant dense<0.000000e+00> : vector<8x128xf32>
    %40 = tpu.matmul %38, %39, %cst_21 {dimension_numbers = #tpu.dot_dimension_numbers<[1], [0], [0], [1], [0, 0, 1, 1], [], []>} : vector<8x32xbf16>, vector<32x128xbf16>, vector<8x128xf32> -> vector<8x128xf32>
    %c0_22 = arith.constant 0 : index
    %c0_23 = arith.constant 0 : index
    %41 = vector.load %arg8[%c0_22, %c0_23] : memref<1x128xf32, #tpu.memory_space<vmem>>, vector<1x128xf32>
    %42 = vector.broadcast %41 : vector<1x128xf32> to vector<8x128xf32>
    %43 = arith.addf %40, %42 : vector<8x128xf32>
    %cst_24 = arith.constant 5.000000e-01 : f32
    %44 = vector.broadcast %cst_24 : f32 to vector<8x128xf32>
    %45 = arith.mulf %44, %43 : vector<8x128xf32>
    %cst_25 = arith.constant 4.471500e-02 : f32
    %46 = vector.broadcast %cst_25 : f32 to vector<8x128xf32>
    %47 = arith.mulf %46, %43 : vector<8x128xf32>
    %48 = arith.mulf %47, %43 : vector<8x128xf32>
    %49 = arith.mulf %48, %43 : vector<8x128xf32>
    %50 = arith.addf %43, %49 : vector<8x128xf32>
    %cst_26 = arith.constant 0.797884583 : f32
    %51 = vector.broadcast %cst_26 : f32 to vector<8x128xf32>
    %52 = arith.mulf %51, %50 : vector<8x128xf32>
    %53 = math.tanh %52 : vector<8x128xf32>
    %cst_27 = arith.constant 1.000000e+00 : f32
    %54 = vector.broadcast %cst_27 : f32 to vector<8x128xf32>
    %55 = arith.addf %54, %53 : vector<8x128xf32>
    %56 = arith.mulf %45, %55 : vector<8x128xf32>
    %57 = arith.truncf %56 : vector<8x128xf32> to vector<8x128xbf16>
    %c0_28 = arith.constant 0 : index
    %c0_29 = arith.constant 0 : index
    %58 = vector.load %arg9[%c0_28, %c0_29] : memref<128x32xbf16, #tpu.memory_space<vmem>>, vector<128x32xbf16>
    %cst_30 = arith.constant dense<0.000000e+00> : vector<8x32xf32>
    %59 = tpu.matmul %57, %58, %cst_30 {dimension_numbers = #tpu.dot_dimension_numbers<[1], [0], [0], [1], [0, 0, 1, 1], [], []>} : vector<8x128xbf16>, vector<128x32xbf16>, vector<8x32xf32> -> vector<8x32xf32>
    %c0_31 = arith.constant 0 : index
    %c0_32 = arith.constant 0 : index
    %60 = vector.load %arg10[%c0_31, %c0_32] : memref<1x32xf32, #tpu.memory_space<vmem>>, vector<1x32xf32>
    %61 = vector.broadcast %60 : vector<1x32xf32> to vector<8x32xf32>
    %62 = arith.addf %59, %61 : vector<8x32xf32>
    %63 = arith.addf %62, %37 : vector<8x32xf32>
    %c0_33 = arith.constant 0 : index
    %c0_34 = arith.constant 0 : index
    %64 = vector.load %arg11[%c0_33, %c0_34] : memref<1x32xf32, #tpu.memory_space<vmem>>, vector<1x32xf32>
    %c0_35 = arith.constant 0 : index
    %c0_36 = arith.constant 0 : index
    %65 = vector.load %arg12[%c0_35, %c0_36] : memref<1x32xf32, #tpu.memory_space<vmem>>, vector<1x32xf32>
    %cst_37 = arith.constant dense<0.000000e+00> : vector<8xf32>
    %66 = vector.multi_reduction <add>, %63, %cst_37 [1] : vector<8x32xf32> to vector<8xf32>
    %67 = vector.shape_cast %66 : vector<8xf32> to vector<8x1xf32>
    %cst_38 = arith.constant 3.200000e+01 : f32
    %68 = vector.broadcast %cst_38 : f32 to vector<8x1xf32>
    %69 = arith.divf %67, %68 : vector<8x1xf32>
    %70 = vector.broadcast %69 : vector<8x1xf32> to vector<8x32xf32>
    %71 = arith.subf %63, %70 : vector<8x32xf32>
    %72 = arith.mulf %71, %71 : vector<8x32xf32>
    %cst_39 = arith.constant dense<0.000000e+00> : vector<8xf32>
    %73 = vector.multi_reduction <add>, %72, %cst_39 [1] : vector<8x32xf32> to vector<8xf32>
    %74 = vector.shape_cast %73 : vector<8xf32> to vector<8x1xf32>
    %cst_40 = arith.constant 3.200000e+01 : f32
    %75 = vector.broadcast %cst_40 : f32 to vector<8x1xf32>
    %76 = arith.divf %74, %75 : vector<8x1xf32>
    %77 = vector.broadcast %69 : vector<8x1xf32> to vector<8x32xf32>
    %78 = arith.subf %63, %77 : vector<8x32xf32>
    %cst_41 = arith.constant 9.99999996E-13 : f32
    %79 = vector.broadcast %cst_41 : f32 to vector<8x1xf32>
    %80 = arith.addf %76, %79 : vector<8x1xf32>
    %81 = math.rsqrt %80 : vector<8x1xf32>
    %82 = vector.broadcast %81 : vector<8x1xf32> to vector<8x32xf32>
    %83 = arith.mulf %78, %82 : vector<8x32xf32>
    %84 = vector.broadcast %64 : vector<1x32xf32> to vector<8x32xf32>
    %85 = arith.mulf %83, %84 : vector<8x32xf32>
    %86 = vector.broadcast %65 : vector<1x32xf32> to vector<8x32xf32>
    %87 = arith.addf %85, %86 : vector<8x32xf32>
    %c0_42 = arith.constant 0 : index
    %c0_43 = arith.constant 0 : index
    %c0_44 = arith.constant 0 : index
    %88 = vector.load %arg13[%c0_42, %c0_43, %c0_44] : memref<1x8x32xf32, #tpu.memory_space<vmem>>, vector<1x8x32xf32>
    %89 = vector.shape_cast %88 : vector<1x8x32xf32> to vector<8x32xf32>
    %90 = vector.shape_cast %87 : vector<8x32xf32> to vector<1x8x32xf32>
    tpu.vector_store %arg13[%c0_42, %c0_43, %c0_44], %90 {strides = array<i32>} : memref<1x8x32xf32, #tpu.memory_space<vmem>>, vector<1x8x32xf32>,
    return
  }
  func.func @transform_0(%arg0: i32) -> (i32, i32, i32) {
    %c0_i32 = arith.constant 0 : i32
    %c0_i32_0 = arith.constant 0 : i32
    %c0_i32_1 = arith.constant 0 : i32
    return %arg0, %c0_i32, %c0_i32_0 : i32, i32, i32
  }
  func.func @transform_1(%arg0: i32) -> (i32, i32) {
    %c0_i32 = arith.constant 0 : i32
    %c0_i32_0 = arith.constant 0 : i32
    %c0_i32_1 = arith.constant 0 : i32
    return %c0_i32, %c0_i32_0 : i32, i32
  }
  func.func @transform_2(%arg0: i32) -> (i32, i32) {
    %c0_i32 = arith.constant 0 : i32
    %c0_i32_0 = arith.constant 0 : i32
    %c0_i32_1 = arith.constant 0 : i32
    return %c0_i32, %c0_i32_0 : i32, i32
  }
  func.func @transform_3(%arg0: i32) -> (i32, i32) {
    %c0_i32 = arith.constant 0 : i32
    %c0_i32_0 = arith.constant 0 : i32
    %c0_i32_1 = arith.constant 0 : i32
    return %c0_i32, %c0_i32_0 : i32, i32
  }
  func.func @transform_4(%arg0: i32) -> (i32, i32) {
    %c0_i32 = arith.constant 0 : i32
    %c0_i32_0 = arith.constant 0 : i32
    %c0_i32_1 = arith.constant 0 : i32
    return %c0_i32, %c0_i32_0 : i32, i32
  }
  func.func @transform_5(%arg0: i32) -> (i32, i32) {
    %c0_i32 = arith.constant 0 : i32
    %c0_i32_0 = arith.constant 0 : i32
    %c0_i32_1 = arith.constant 0 : i32
    return %c0_i32, %c0_i32_0 : i32, i32
  }
  func.func @transform_6(%arg0: i32) -> (i32, i32) {
    %c0_i32 = arith.constant 0 : i32
    %c0_i32_0 = arith.constant 0 : i32
    %c0_i32_1 = arith.constant 0 : i32
    return %c0_i32, %c0_i32_0 : i32, i32
  }
  func.func @transform_7(%arg0: i32) -> (i32, i32) {
    %c0_i32 = arith.constant 0 : i32
    %c0_i32_0 = arith.constant 0 : i32
    %c0_i32_1 = arith.constant 0 : i32
    return %c0_i32, %c0_i32_0 : i32, i32
  }
  func.func @transform_8(%arg0: i32) -> (i32, i32) {
    %c0_i32 = arith.constant 0 : i32
    %c0_i32_0 = arith.constant 0 : i32
    %c0_i32_1 = arith.constant 0 : i32
    return %c0_i32, %c0_i32_0 : i32, i32
  }
  func.func @transform_9(%arg0: i32) -> (i32, i32) {
    %c0_i32 = arith.constant 0 : i32
    %c0_i32_0 = arith.constant 0 : i32
    %c0_i32_1 = arith.constant 0 : i32
    return %c0_i32, %c0_i32_0 : i32, i32
  }
  func.func @transform_10(%arg0: i32) -> (i32, i32) {
    %c0_i32 = arith.constant 0 : i32
    %c0_i32_0 = arith.constant 0 : i32
    %c0_i32_1 = arith.constant 0 : i32
    return %c0_i32, %c0_i32_0 : i32, i32
  }
  func.func @transform_11(%arg0: i32) -> (i32, i32) {
    %c0_i32 = arith.constant 0 : i32
    %c0_i32_0 = arith.constant 0 : i32
    %c0_i32_1 = arith.constant 0 : i32
    return %c0_i32, %c0_i32_0 : i32, i32
  }
  func.func @transform_12(%arg0: i32) -> (i32, i32, i32) {
    %c0_i32 = arith.constant 0 : i32
    %c0_i32_0 = arith.constant 0 : i32
    %c0_i32_1 = arith.constant 0 : i32
    return %arg0, %c0_i32, %c0_i32_0 : i32, i32, i32
  }
}

module attributes {stable_mosaic.version = 11 : i64} {
  func.func @fnet_layer_kernel(%arg0: i32, %arg1: memref<1x8x32xf32, #tpu.memory_space<vmem>>, %arg2: memref<16x8xbf16, #tpu.memory_space<vmem>>, %arg3: memref<32x32xbf16, #tpu.memory_space<vmem>>, %arg4: memref<32x32xbf16, #tpu.memory_space<vmem>>, %arg5: memref<1x32xf32, #tpu.memory_space<vmem>>, %arg6: memref<1x32xf32, #tpu.memory_space<vmem>>, %arg7: memref<32x128xbf16, #tpu.memory_space<vmem>>, %arg8: memref<1x128xf32, #tpu.memory_space<vmem>>, %arg9: memref<128x32xbf16, #tpu.memory_space<vmem>>, %arg10: memref<1x32xf32, #tpu.memory_space<vmem>>, %arg11: memref<1x32xf32, #tpu.memory_space<vmem>>, %arg12: memref<1x32xf32, #tpu.memory_space<vmem>>, %arg13: memref<1x8x32xf32, #tpu.memory_space<vmem>>) attributes {dimension_semantics = [#tpu.dimension_semantics<parallel>], iteration_bounds = array<i64: 2>, scalar_prefetch = 0 : i64, scratch_operands = 0 : i64, tpu.core_type = #tpu.core_type<tc>, window_params = [{transform_indices = @transform_0, window_bounds = array<i64: 1, 8, 32>}, {pipeline_mode = #tpu.pipeline_mode<synchronous>, transform_indices = @transform_1, window_bounds = array<i64: 16, 8>}, {pipeline_mode = #tpu.pipeline_mode<synchronous>, transform_indices = @transform_2, window_bounds = array<i64: 32, 32>}, {pipeline_mode = #tpu.pipeline_mode<synchronous>, transform_indices = @transform_3, window_bounds = array<i64: 32, 32>}, {pipeline_mode = #tpu.pipeline_mode<synchronous>, transform_indices = @transform_4, window_bounds = array<i64: 1, 32>}, {pipeline_mode = #tpu.pipeline_mode<synchronous>, transform_indices = @transform_5, window_bounds = array<i64: 1, 32>}, {pipeline_mode = #tpu.pipeline_mode<synchronous>, transform_indices = @transform_6, window_bounds = array<i64: 32, 128>}, {pipeline_mode = #tpu.pipeline_mode<synchronous>, transform_indices = @transform_7, window_bounds = array<i64: 1, 128>}, {pipeline_mode = #tpu.pipeline_mode<synchronous>, transform_indices = @transform_8, window_bounds = array<i64: 128, 32>}, {pipeline_mode = #tpu.pipeline_mode<synchronous>, transform_indices = @transform_9, window_bounds = array<i64: 1, 32>}, {pipeline_mode = #tpu.pipeline_mode<synchronous>, transform_indices = @transform_10, window_bounds = array<i64: 1, 32>}, {pipeline_mode = #tpu.pipeline_mode<synchronous>, transform_indices = @transform_11, window_bounds = array<i64: 1, 32>}, {transform_indices = @transform_12, window_bounds = array<i64: 1, 8, 32>}]} {
    %c0 = arith.constant 0 : index
    %c0_0 = arith.constant 0 : index
    %c0_1 = arith.constant 0 : index
    %0 = vector.load %arg1[%c0, %c0_0, %c0_1] : memref<1x8x32xf32, #tpu.memory_space<vmem>>, vector<1x8x32xf32>
    %1 = vector.shape_cast %0 : vector<1x8x32xf32> to vector<8x32xf32>
    %2 = arith.truncf %1 : vector<8x32xf32> to vector<8x32xbf16>
    %c0_2 = arith.constant 0 : index
    %c0_3 = arith.constant 0 : index
    %3 = vector.load %arg2[%c0_2, %c0_3] : memref<16x8xbf16, #tpu.memory_space<vmem>>, vector<16x8xbf16>
    %cst = arith.constant dense<0.000000e+00> : vector<16x32xf32>
    %4 = tpu.matmul %3, %2, %cst {dimension_numbers = #tpu.dot_dimension_numbers<[1], [0], [0], [1], [0, 0, 1, 1], [], []>} : vector<16x8xbf16>, vector<8x32xbf16>, vector<16x32xf32> -> vector<16x32xf32>
    %5 = arith.truncf %4 : vector<16x32xf32> to vector<16x32xbf16>
    %6 = vector.extract_strided_slice %5 {offsets = [0, 0], sizes = [8, 32], strides = [1, 1]} : vector<16x32xbf16> to vector<8x32xbf16>
    %7 = vector.extract_strided_slice %5 {offsets = [8, 0], sizes = [8, 32], strides = [1, 1]} : vector<16x32xbf16> to vector<8x32xbf16>
    %c0_4 = arith.constant 0 : index
    %c0_5 = arith.constant 0 : index
    %8 = vector.load %arg3[%c0_4, %c0_5] : memref<32x32xbf16, #tpu.memory_space<vmem>>, vector<32x32xbf16>
    %cst_6 = arith.constant dense<0.000000e+00> : vector<8x32xf32>
    %9 = tpu.matmul %6, %8, %cst_6 {dimension_numbers = #tpu.dot_dimension_numbers<[1], [0], [0], [1], [0, 0, 1, 1], [], []>} : vector<8x32xbf16>, vector<32x32xbf16>, vector<8x32xf32> -> vector<8x32xf32>
    %c0_7 = arith.constant 0 : index
    %c0_8 = arith.constant 0 : index
    %10 = vector.load %arg4[%c0_7, %c0_8] : memref<32x32xbf16, #tpu.memory_space<vmem>>, vector<32x32xbf16>
    %cst_9 = arith.constant dense<0.000000e+00> : vector<8x32xf32>
    %11 = tpu.matmul %7, %10, %cst_9 {dimension_numbers = #tpu.dot_dimension_numbers<[1], [0], [0], [1], [0, 0, 1, 1], [], []>} : vector<8x32xbf16>, vector<32x32xbf16>, vector<8x32xf32> -> vector<8x32xf32>
    %12 = arith.subf %9, %11 : vector<8x32xf32>
    %13 = arith.addf %12, %1 : vector<8x32xf32>
    %c0_10 = arith.constant 0 : index
    %c0_11 = arith.constant 0 : index
    %14 = vector.load %arg5[%c0_10, %c0_11] : memref<1x32xf32, #tpu.memory_space<vmem>>, vector<1x32xf32>
    %c0_12 = arith.constant 0 : index
    %c0_13 = arith.constant 0 : index
    %15 = vector.load %arg6[%c0_12, %c0_13] : memref<1x32xf32, #tpu.memory_space<vmem>>, vector<1x32xf32>
    %cst_14 = arith.constant dense<0.000000e+00> : vector<8xf32>
    %16 = vector.multi_reduction <add>, %13, %cst_14 [1] : vector<8x32xf32> to vector<8xf32>
    %17 = vector.shape_cast %16 : vector<8xf32> to vector<8x1xf32>
    %cst_15 = arith.constant 3.200000e+01 : f32
    %18 = vector.broadcast %cst_15 : f32 to vector<8x1xf32>
    %19 = arith.divf %17, %18 : vector<8x1xf32>
    %20 = vector.broadcast %19 : vector<8x1xf32> to vector<8x32xf32>
    %21 = arith.subf %13, %20 : vector<8x32xf32>
    %22 = arith.mulf %21, %21 : vector<8x32xf32>
    %cst_16 = arith.constant dense<0.000000e+00> : vector<8xf32>
    %23 = vector.multi_reduction <add>, %22, %cst_16 [1] : vector<8x32xf32> to vector<8xf32>
    %24 = vector.shape_cast %23 : vector<8xf32> to vector<8x1xf32>
    %cst_17 = arith.constant 3.200000e+01 : f32
    %25 = vector.broadcast %cst_17 : f32 to vector<8x1xf32>
    %26 = arith.divf %24, %25 : vector<8x1xf32>
    %27 = vector.broadcast %19 : vector<8x1xf32> to vector<8x32xf32>
    %28 = arith.subf %13, %27 : vector<8x32xf32>
    %cst_18 = arith.constant 9.99999996E-13 : f32
    %29 = vector.broadcast %cst_18 : f32 to vector<8x1xf32>
    %30 = arith.addf %26, %29 : vector<8x1xf32>
    %31 = math.rsqrt %30 : vector<8x1xf32>
    %32 = vector.broadcast %31 : vector<8x1xf32> to vector<8x32xf32>
    %33 = arith.mulf %28, %32 : vector<8x32xf32>
    %34 = vector.broadcast %14 : vector<1x32xf32> to vector<8x32xf32>
    %35 = arith.mulf %33, %34 : vector<8x32xf32>
    %36 = vector.broadcast %15 : vector<1x32xf32> to vector<8x32xf32>
    %37 = arith.addf %35, %36 : vector<8x32xf32>
    %38 = arith.truncf %37 : vector<8x32xf32> to vector<8x32xbf16>
    %c0_19 = arith.constant 0 : index
    %c0_20 = arith.constant 0 : index
    %39 = vector.load %arg7[%c0_19, %c0_20] : memref<32x128xbf16, #tpu.memory_space<vmem>>, vector<32x128xbf16>
    %cst_21 = arith.constant dense<0.000000e+00> : vector<8x128xf32>
    %40 = tpu.matmul %38, %39, %cst_21 {dimension_numbers = #tpu.dot_dimension_numbers<[1], [0], [0], [1], [0, 0, 1, 1], [], []>} : vector<8x32xbf16>, vector<32x128xbf16>, vector<8x128xf32> -> vector<8x128xf32>
    %c0_22 = arith.constant 0 : index
    %c0_23 = arith.constant 0 : index
    %41 = vector.load %arg8[%c0_22, %c0_23] : memref<1x128xf32, #tpu.memory_space<vmem>>, vector<1x128xf32>
    %42 = vector.broadcast %41 : vector<1x128xf32> to vector<8x128xf32>
    %43 = arith.addf %40, %42 : vector<8x128xf32>
    %cst_24 = arith.constant 5.000000e-01 : f32
    %44 = vector.broadcast %cst_24 : f32 to vector<8x128xf32>
    %45 = arith.mulf %44, %43 : vector<8x128xf32>
    %cst_25 = arith.constant 4.471500e-02 : f32
    %46 = vector.broadcast %cst_25 : f32 to vector<8x128xf32>
    %47 = arith.mulf %46, %43 : vector<8x128xf32>
    %48 = arith.mulf %47, %43 : vector<8x128xf32>
    %49 = arith.mulf %48, %43 : vector<8x128xf32>
    %50 = arith.addf %43, %49 : vector<8x128xf32>
    %cst_26 = arith.constant 0.797884583 : f32
    %51 = vector.broadcast %cst_26 : f32 to vector<8x128xf32>
    %52 = arith.mulf %51, %50 : vector<8x128xf32>
    %53 = math.tanh %52 : vector<8x128xf32>
    %cst_27 = arith.constant 1.000000e+00 : f32
    %54 = vector.broadcast %cst_27 : f32 to vector<8x128xf32>
    %55 = arith.addf %54, %53 : vector<8x128xf32>
    %56 = arith.mulf %45, %55 : vector<8x128xf32>
    %57 = arith.truncf %56 : vector<8x128xf32> to vector<8x128xbf16>
    %c0_28 = arith.constant 0 : index
    %c0_29 = arith.constant 0 : index
    %58 = vector.load %arg9[%c0_28, %c0_29] : memref<128x32xbf16, #tpu.memory_space<vmem>>, vector<128x32xbf16>
    %cst_30 = arith.constant dense<0.000000e+00> : vector<8x32xf32>
    %59 = tpu.matmul %57, %58, %cst_30 {dimension_numbers = #tpu.dot_dimension_numbers<[1], [0], [0], [1], [0, 0, 1, 1], [], []>} : vector<8x128xbf16>, vector<128x32xbf16>, vector<8x32xf32> -> vector<8x32xf32>
    %c0_31 = arith.constant 0 : index
    %c0_32 = arith.constant 0 : index
    %60 = vector.load %arg10[%c0_31, %c0_32] : memref<1x32xf32, #tpu.memory_space<vmem>>, vector<1x32xf32>
    %61 = vector.broadcast %60 : vector<1x32xf32> to vector<8x32xf32>
    %62 = arith.addf %59, %61 : vector<8x32xf32>
    %63 = arith.addf %62, %37 : vector<8x32xf32>
    %c0_33 = arith.constant 0 : index
    %c0_34 = arith.constant 0 : index
    %64 = vector.load %arg11[%c0_33, %c0_34] : memref<1x32xf32, #tpu.memory_space<vmem>>, vector<1x32xf32>
    %c0_35 = arith.constant 0 : index
    %c0_36 = arith.constant 0 : index
    %65 = vector.load %arg12[%c0_35, %c0_36] : memref<1x32xf32, #tpu.memory_space<vmem>>, vector<1x32xf32>
    %cst_37 = arith.constant dense<0.000000e+00> : vector<8xf32>
    %66 = vector.multi_reduction <add>, %63, %cst_37 [1] : vector<8x32xf32> to vector<8xf32>
    %67 = vector.shape_cast %66 : vector<8xf32> to vector<8x1xf32>
    %cst_38 = arith.constant 3.200000e+01 : f32
    %68 = vector.broadcast %cst_38 : f32 to vector<8x1xf32>
    %69 = arith.divf %67, %68 : vector<8x1xf32>
    %70 = vector.broadcast %69 : vector<8x1xf32> to vector<8x32xf32>
    %71 = arith.subf %63, %70 : vector<8x32xf32>
    %72 = arith.mulf %71, %71 : vector<8x32xf32>
    %cst_39 = arith.constant dense<0.000000e+00> : vector<8xf32>
    %73 = vector.multi_reduction <add>, %72, %cst_39 [1] : vector<8x32xf32> to vector<8xf32>
    %74 = vector.shape_cast %73 : vector<8xf32> to vector<8x1xf32>
    %cst_40 = arith.constant 3.200000e+01 : f32
    %75 = vector.broadcast %cst_40 : f32 to vector<8x1xf32>
    %76 = arith.divf %74, %75 : vector<8x1xf32>
    %77 = vector.broadcast %69 : vector<8x1xf32> to vector<8x32xf32>
    %78 = arith.subf %63, %77 : vector<8x32xf32>
    %cst_41 = arith.constant 9.99999996E-13 : f32
    %79 = vector.broadcast %cst_41 : f32 to vector<8x1xf32>
    %80 = arith.addf %76, %79 : vector<8x1xf32>
    %81 = math.rsqrt %80 : vector<8x1xf32>
    %82 = vector.broadcast %81 : vector<8x1xf32> to vector<8x32xf32>
    %83 = arith.mulf %78, %82 : vector<8x32xf32>
    %84 = vector.broadcast %64 : vector<1x32xf32> to vector<8x32xf32>
    %85 = arith.mulf %83, %84 : vector<8x32xf32>
    %86 = vector.broadcast %65 : vector<1x32xf32> to vector<8x32xf32>
    %87 = arith.addf %85, %86 : vector<8x32xf32>
    %c0_42 = arith.constant 0 : index
    %c0_43 = arith.constant 0 : index
    %c0_44 = arith.constant 0 : index
    %88 = vector.load %arg13[%c0_42, %c0_43, %c0_44] : memref<1x8x32xf32, #tpu.memory_space<vmem>>, vector<1x8x32xf32>
    %89 = vector.shape_cast %88 : vector<1x8x32xf32> to vector<8x32xf32>
    %90 = vector.shape_cast %87 : vector<8x32xf32> to vector<1x8x32xf32>
    tpu.vector_store %arg13[%c0_42, %c0_43, %c0_44], %90 {strides = array<i32>} : memref<1x8x32xf32, #tpu.memory_space<vmem>>, vector<1x8x32xf32>,
    return
  }
  func.func @transform_0(%arg0: i32) -> (i32, i32, i32) {
    %c0_i32 = arith.constant 0 : i32
    %c0_i32_0 = arith.constant 0 : i32
    %c0_i32_1 = arith.constant 0 : i32
    return %arg0, %c0_i32, %c0_i32_0 : i32, i32, i32
  }
  func.func @transform_1(%arg0: i32) -> (i32, i32) {
    %c0_i32 = arith.constant 0 : i32
    %c0_i32_0 = arith.constant 0 : i32
    %c0_i32_1 = arith.constant 0 : i32
    return %c0_i32, %c0_i32_0 : i32, i32
  }
  func.func @transform_2(%arg0: i32) -> (i32, i32) {
    %c0_i32 = arith.constant 0 : i32
    %c0_i32_0 = arith.constant 0 : i32
    %c0_i32_1 = arith.constant 0 : i32
    return %c0_i32, %c0_i32_0 : i32, i32
  }
  func.func @transform_3(%arg0: i32) -> (i32, i32) {
    %c0_i32 = arith.constant 0 : i32
    %c0_i32_0 = arith.constant 0 : i32
    %c0_i32_1 = arith.constant 0 : i32
    return %c0_i32, %c0_i32_0 : i32, i32
  }
  func.func @transform_4(%arg0: i32) -> (i32, i32) {
    %c0_i32 = arith.constant 0 : i32
    %c0_i32_0 = arith.constant 0 : i32
    %c0_i32_1 = arith.constant 0 : i32
    return %c0_i32, %c0_i32_0 : i32, i32
  }
  func.func @transform_5(%arg0: i32) -> (i32, i32) {
    %c0_i32 = arith.constant 0 : i32
    %c0_i32_0 = arith.constant 0 : i32
    %c0_i32_1 = arith.constant 0 : i32
    return %c0_i32, %c0_i32_0 : i32, i32
  }
  func.func @transform_6(%arg0: i32) -> (i32, i32) {
    %c0_i32 = arith.constant 0 : i32
    %c0_i32_0 = arith.constant 0 : i32
    %c0_i32_1 = arith.constant 0 : i32
    return %c0_i32, %c0_i32_0 : i32, i32
  }
  func.func @transform_7(%arg0: i32) -> (i32, i32) {
    %c0_i32 = arith.constant 0 : i32
    %c0_i32_0 = arith.constant 0 : i32
    %c0_i32_1 = arith.constant 0 : i32
    return %c0_i32, %c0_i32_0 : i32, i32
  }
  func.func @transform_8(%arg0: i32) -> (i32, i32) {
    %c0_i32 = arith.constant 0 : i32
    %c0_i32_0 = arith.constant 0 : i32
    %c0_i32_1 = arith.constant 0 : i32
    return %c0_i32, %c0_i32_0 : i32, i32
  }
  func.func @transform_9(%arg0: i32) -> (i32, i32) {
    %c0_i32 = arith.constant 0 : i32
    %c0_i32_0 = arith.constant 0 : i32
    %c0_i32_1 = arith.constant 0 : i32
    return %c0_i32, %c0_i32_0 : i32, i32
  }
  func.func @transform_10(%arg0: i32) -> (i32, i32) {
    %c0_i32 = arith.constant 0 : i32
    %c0_i32_0 = arith.constant 0 : i32
    %c0_i32_1 = arith.constant 0 : i32
    return %c0_i32, %c0_i32_0 : i32, i32
  }
  func.func @transform_11(%arg0: i32) -> (i32, i32) {
    %c0_i32 = arith.constant 0 : i32
    %c0_i32_0 = arith.constant 0 : i32
    %c0_i32_1 = arith.constant 0 : i32
    return %c0_i32, %c0_i32_0 : i32, i32
  }
  func.func @transform_12(%arg0: i32) -> (i32, i32, i32) {
    %c0_i32 = arith.constant 0 : i32
    %c0_i32_0 = arith.constant 0 : i32
    %c0_i32_1 = arith.constant 0 : i32
    return %arg0, %c0_i32, %c0_i32_0 : i32, i32, i32
  }
}

</mosaic_0001>

<bundles_post_ra>
// kernel: fnet_encoder.3
= control target key start
LH: loop header
LB: loop body
LE: loop exit
PB: predicated region body
PF: predicated region fallthrough
CT: control target
= control target key end

     0   :  { %17 = vsyncpa [#allocation3], 0  ;;  %s1549_s0 = inlined_call_operand.hbm [shape: f32[2,8,32], index: 0, kind: input, shape index: {}, may-alias: {0,12}]   ;;  %s1550_s1 = inlined_call_operand.vmem [shape: bf16[16,8], index: 1, kind: input, shape index: {}]   ;;  %s1551_s2 = inlined_call_operand.vmem [shape: bf16[32,32], index: 2, kind: input, shape index: {}]   ;;  %s1552_s3 = inlined_call_operand.vmem [shape: bf16[32,32], index: 3, kind: input, shape index: {}]   ;;  %s1553_s4 = inlined_call_operand.vmem [shape: f32[1,32], index: 4, kind: input, shape index: {}]   ;;  %s1554_s5 = inlined_call_operand.vmem [shape: f32[1,32], index: 5, kind: input, shape index: {}]   ;;  %s1555_s6 = inlined_call_operand.vmem [shape: bf16[32,128], index: 6, kind: input, shape index: {}]   ;;  %s1556_s7 = inlined_call_operand.vmem [shape: f32[1,128], index: 7, kind: input, shape index: {}]   ;;  %s1557_s8 = inlined_call_operand.vmem [shape: bf16[128,32], index: 8, kind: input, shape index: {}]   ;;  %s1558_s9 = inlined_call_operand.vmem [shape: f32[1,32], index: 9, kind: input, shape index: {}]   ;;  %s1559_s10 = inlined_call_operand.vmem [shape: f32[1,32], index: 10, kind: input, shape index: {}]   ;;  %s1560_s11 = inlined_call_operand.vmem [shape: f32[1,32], index: 11, kind: input, shape index: {}]   ;;  %s1561_s12 = inlined_call_operand.hbm [shape: f32[2,8,32], index: 12, kind: output, shape index: {}, may-alias: {0,12}]  }
   0x1   :  { %19 = vsyncpa [#allocation3 + $0x1], 0 }
   0x2   :  { %20 = vsyncpa [#allocation4], 0 }
   0x3   :  { %22 = vsyncpa [#allocation4 + $0x1], 0  ;;  %s1288_s21 = smov 0   ;;  %s1290_s22 = smov 0  }
   0x4   :  { %s1292_s23 = smov 0   ;;  %s1294_s24 = smov 0  }
   0x5 LB: > { %1566 = sst [smem:[#allocation8_spill]] %s1213_s23  ;;  %s1309_s25 = sadd.s32 4294967295, %s1217_s24   ;;  %s1217_s24 = sphi %s1294_s24, %s1579_s24   ;;  %s1213_s23 = sphi %s1292_s23, %s1581_s23   ;;  %s1209_s22 = sphi %s1290_s22, %s1583_s22   ;;  %s1205_s21 = sphi %s1288_s21, %s1582_s21  }
   0x6   : > { %s945_s26 = sadd.s32 4294967294, %s1217_s24   ;;  %s1313_s27 = sadd.s32 1, %s1217_s24  }
   0x7   : > { %1567 = sst [smem:[#allocation9_spill]] %s1313_s27  ;;  %s35_s28 = sadd.s32 1, %s1213_s23 }
   0x8   : > { %s32_s29 = ssub.s32 %s1217_s24, %s1313_s27  ;;  %p42_p0 = scmp.ne.s32.totalorder %s1213_s23, %s1209_s22 }
   0x9   : > { %p33_p1 = scmp.eq.s32.totalorder %s32_s29, 0  ;;  %p43_p2 = scmp.eq.s32.totalorder %s1217_s24, 0 }
   0xa   : > { %p48_p3 = scmp.ne.s32.totalorder %s1209_s22, %s1205_s21  ;;  %p49_p4 = scmp.eq.s32.totalorder %s1309_s25, 0 }
   0xb   : > { %s1325_s30 = scalar_select %p33_p1, %s1213_s23, %s35_s28  }
   0xc   : > { %p1327_p5 = por %p43_p2, %p42_p0  ;;  %p1331_p6 = por %p49_p4, %p48_p3 }
   0xd   : > { %1568 = sst [smem:[#allocation10_spill]] %s1325_s30  ;;  %p303_p7 = scmp.eq.s32.totalorder %s1309_s25, 1 }
   0xe   : > { %p309_p8 = scmp.eq.s32.totalorder %s945_s26, 1  ;;  %p1064_p10 = scmp.lt.s32.totalorder %s1217_s24, 2 }
   0xf   : > { %p1338_p11 = por %p303_p7, %p42_p0  ;;  %s362_s17 = sand.u32 1, %s1213_s23  }
  0x10   : > { %p1342_p12 = por %p309_p8, %p48_p3  ;;  %s949_s18 = sshll.u32 %s1217_s24, 7 }
  0x11   : > { %s1571_s15 = scalar_select %p1338_p11, 1, 0 }
  0x12   : > { %s1572_s16 = scalar_select %p1342_p12, 1, 0 }
  0x13   : > { %s948_s19 = sshll.u32 %s362_s17, 3  ;;  %s1351_s29 = scalar_lea.hbm %s1549_s0, %s949_s18 }
  0x14   : > { %s366_s26 = scalar_lea.vmem [#allocation2], %s948_s19  ;;  %p1355_p13 = pnand %p1064_p10, %p1327_p5 }
  0x15   : > { %s373_s30 = sshll.u32 %s366_s26, 4  ;;  %s363_s20 = scalar_lea.sflag [#allocation3], %s362_s17  ;;  %s1359_s30 = int_to_ptr.vmem [resolvable:$true] %s373_s30 }
  0x16   : > { %s1121_s18 = scalar_lea.hbm %s1351_s29, 128  ;;  %p1123_p3 = pneg %p1355_p13 }
  0x17   : > { %p1122_p2 = scmp.ne.s32.totalorder %s1351_s29, %s1121_s18  ;;  %s1126_s28 = scalar_lea.hbm %s1549_s0, 256 }
  0x18   : > { %p1127_p5 = scmp.lt.u32.totalorder %s1351_s29, %s1549_s0  ;;  %p1128_p8 = scmp.lt.u32.totalorder %s1126_s28, %s1121_s18 }
  0x19   : > { %p1124_p4 = pnand %p1123_p3, %p1122_p2  ;;  %p1130_p9 = scmp.lt.u32.totalorder %s1121_s18, %s1351_s29 }
  0x1a   : > { %p1129_p10 = por %p1128_p8, %p1127_p5 }
  0x1b   : > { %p1125_p7 = pneg %p1124_p4 }
  0x1c   : > { %p1131_p0 = por %p1130_p9, %p1129_p10 }
  0x1e   : > { %p1132_p1 = pnand %p1131_p0, %p1125_p7 }
  0x20   : > { %1135 = shalt.err (!%p1132_p1)
}
  0x21   : > { %s1136_s17 = scalar_lea.vmem %s1359_s30, 128  ;;  %s1219_s13 = smov [#allocation2]  }
  0x22   : > { %p1137_p2 = scmp.ne.s32.totalorder %s1359_s30, %s1136_s17  ;;  %s1141_s19 = sshll.u32 %s1219_s13, 4  ;;  %s1142_s19 = int_to_ptr.vmem [resolvable:$false] %s1141_s19 }
  0x23   : > { %s1143_s23 = scalar_lea.vmem %s1142_s19, 256  ;;  %p1144_p11 = scmp.lt.s32.totalorder %s1359_s30, %s1142_s19 }
  0x24   : > { %p1139_p4 = pnand %p1137_p2, %p1123_p3  ;;  %p1145_p5 = scmp.lt.s32.totalorder %s1143_s23, %s1136_s17 }
  0x26   : > { %p1140_p12 = pneg %p1139_p4  ;;  %p1146_p8 = por %p1145_p5, %p1144_p11 }
  0x28   : > { %p1147_p9 = pnand %p1146_p8, %p1140_p12 }
  0x2a   : > { %1150 = shalt.err (!%p1147_p9)
}
  0x2b   : > { %1059 = dma.hbm_to_vmem [thread:$0]  (!%p1355_p13), %s1351_s29, 128, %s1359_s30, %s363_s20  }
  0x2c   : > { %p1574_p0 = scmp.lt.s32.totalorder %s1217_s24, 3  ;;  %p1575_p1 = scmp.ge.s32.totalorder %s1217_s24, 1 }
  0x2e   : > { %p379_p3 = pnand %p1575_p1, %p1574_p0 }
  0x2f   : > { %s1393_s18 = sand.u32 (!%p379_p3), 1, %s1209_s22  }
  0x30   : > { %382 = sbr.rel (%p379_p3) target bundleno = 1602 (0x642), region = 68  ;;  %s951_s28 = sshll.u32 (!%p379_p3), %s1393_s18, 3 }
  0x31   : > { %s385_s26 = scalar_lea.sflag (!%p379_p3), [#allocation3], %s1393_s18  ;;  %s388_s27 = scalar_lea.vmem (!%p379_p3), [#allocation2], %s951_s28 }
  0x37   : > { %1196 = dma.done.wait (%p1331_p6), %s385_s26, 128  }
  0x38   : > { %1198 = vsyncadd (%p1331_p6), %s385_s26, 4294967168  ;;  %v1220_v0 = vmov 0.0   ;;  %vm1221_vm0 = vmmov 0   ;;  %v430_v1 = vld [vmem:[%s388_s27] sm:$0xff]  ;;  %vm443_vm1 = vcmask 1043456   ;;  %vm439_vm2 = vcmask 64512  }
  0x39   : > { %1002 = vmatprep.subr.bf16.mxu1 %v1220_v0  ;;  %1004 = vmatprep.mubr.msk.bf16.mxu1 %vm1221_vm0, %v1220_v0  ;;  %v431_v2 = vpack.c.bf16 %v430_v1, %v430_v1  ;;  %v1100_v3 = vld [vmem:[%s1550_s1] sm:$0xff]   ;;  %v1102_v6 = vld [vmem:[%s1551_s2 + $0x8] sm:$0xff]   ;;  %vm505_vm3 = vcmask 261120   ;;  %v1109_v45 = vld [vmem:[%s1557_s8 + $0x10] sm:$0xff]   ;;  %s979_s14 = sshll.u32 %s1309_s25, 7  ;;  %s428_s20 = scalar_lea.vmem [#allocation5], %s951_s28 }
  0x3a   : > { %1032 = vmatprep.subr.bf16.mxu0 %v1220_v0  ;;  %1048 = vmatprep.mubr.msk.bf16.mxu0 %vm1221_vm0, %v1220_v0  ;;  %v1101_v5 = vld [vmem:[%s1551_s2] sm:$0xff]   ;;  %v1104_v13 = vld [vmem:[%s1552_s3 + $0x8] sm:$0xff]   ;;  %v1110_v46 = vld [vmem:[%s1557_s8 + $0x18] sm:$0xff]   ;;  %s875_s17 = sshll.u32 %s428_s20, 4  ;;  %s1504_s23 = scalar_lea.hbm %s1561_s12, %s979_s14  ;;  %s1506_s17 = int_to_ptr.vmem [resolvable:$true] %s875_s17 }
  0x3b   : > { %v445_v4 = vsel %vm443_vm1, %v431_v2, 0  ;;  %v1103_v10 = vld [vmem:[%s1552_s3] sm:$0xff]   ;;  %v1106_v32 = vld [vmem:[%s1555_s6 + $0x8] sm:$0xff]   ;;  %v1113_v49 = vld [vmem:[%s1557_s8 + $0x30] sm:$0xff]   ;;  %s862_s26 = scalar_lea.sflag [#allocation4], %s1393_s18  ;;  %s1151_s27 = scalar_lea.vmem %s1506_s17, 128 }
  0x3c   : > { %1003 = vmatpush3.bf16.msra.mxu1 %v445_v4  ;;  %v1105_v31 = vld [vmem:[%s1555_s6] sm:$0xff]   ;;  %v1108_v44 = vld [vmem:[%s1557_s8 + $0x8] sm:$0xff]   ;;  %v1114_v50 = vld [vmem:[%s1557_s8 + $0x38] sm:$0xff]   ;;  %p1152_p6 = scmp.ne.s32.totalorder %s1506_s17, %s1151_s27  ;;  %p1576_p11 = scmp.ne.s32.totalorder %s1571_s15, 0 }
  0x3d   : > { %1008 = vmatprep.subr.bf16.mxu1 %v1220_v0  ;;  %v1107_v33 = vld [vmem:[%s1557_s8] sm:$0xff]   ;;  %v1112_v48 = vld [vmem:[%s1557_s8 + $0x28] sm:$0xff]   ;;  %s1222_s25 = smov [#allocation5]  }
  0x3e   : > { %1033 = vmatpush3.bf16.msra.mxu0 %v1107_v33  ;;  %v961_v38 = vld [vmem:[%s1553_s4] ss:$0 sm:$0xff]  ;;  %p1153_p12 = pnand %p1152_p6, %p1576_p11  ;;  %s1155_s28 = sshll.u32 %s1222_s25, 4  ;;  %s1156_s28 = int_to_ptr.vmem [resolvable:$false] %s1155_s28 }
  0x3f   : > { %1005 = vmatmul.mubr.msk.bf16.vlgmr.msra.gmra.mrb[0].mxu1 %vm439_vm2, %v1100_v3  ;;  %1034 = vmatprep.subr.bf16.mxu0 %v1220_v0  ;;  %v962_v40 = vld [vmem:[%s1554_s5] ss:$0 sm:$0xff]  ;;  %s1157_s30 = scalar_lea.vmem %s1156_s28, 256  ;;  %p1158_p7 = scmp.lt.s32.totalorder %s1506_s17, %s1156_s28 }
  0x40   : > { %1009 = vmatpush3.bf16.msra.mxu1 %v1101_v5  ;;  %1012 = vmatprep.mubr.msk.bf16.mxu1 %vm1221_vm0, %v1220_v0  ;;  %v1111_v47 = vld [vmem:[%s1557_s8 + $0x20] sm:$0xff]   ;;  %p1154_p13 = pneg %p1153_p12  ;;  %p1159_p10 = scmp.lt.s32.totalorder %s1157_s30, %s1151_s27 }
  0x41   : > { %1010 = vmatprep.subr.bf16.mxu1 %v1220_v0  ;;  %v963_v51 = vld [vmem:[%s1556_s7] ss:$0 sm:$0xff] }
  0x42   : > { %1035 = vmatpush3.bf16.msra.mxu0 %v1108_v44  ;;  %v967_v3 = vld [vmem:[%s1558_s9] ss:$0 sm:$0xff]  ;;  %p1160_p2 = por %p1159_p10, %p1158_p7 }
  0x43   : > { %1036 = vmatprep.subr.bf16.mxu0 %v1220_v0 }
  0x44   : > { %1011 = vmatpush3.bf16.msra.mxu1 %v1102_v6  ;;  %p1161_p4 = pnand %p1160_p2, %p1154_p13 }
  0x45   : > { %1016 = vmatprep.subr.bf16.mxu1 %v1220_v0 }
  0x46   : > { %1037 = vmatpush3.bf16.msra.mxu0 %v1109_v45 }
  0x47   : > { %1038 = vmatprep.subr.bf16.mxu0 %v1220_v0 }
  0x4a   : > { %1039 = vmatpush3.bf16.msra.mxu0 %v1110_v46 }
  0x4b   : > { %1040 = vmatprep.subr.bf16.mxu0 %v1220_v0 }
  0x4e   : > { %1041 = vmatpush3.bf16.msra.mxu0 %v1111_v47 }
  0x4f   : > { %1042 = vmatprep.subr.bf16.mxu0 %v1220_v0 }
  0x52   : > { %1043 = vmatpush3.bf16.msra.mxu0 %v1112_v48 }
  0x53   : > { %1044 = vmatprep.subr.bf16.mxu0 %v1220_v0 }
  0x56   : > { %1045 = vmatpush3.bf16.msra.mxu0 %v1113_v49 }
  0x57   : > { %1046 = vmatprep.subr.bf16.mxu0 %v1220_v0 }
  0x5a   : > { %1047 = vmatpush3.bf16.msra.mxu0 %v1114_v50 }
 0x112   : > { %v481_v7 = vpop.f32.mrb[0].mxu1 }
 0x113   : > { %v1006_v8 = vpop.f32.mrb[1].mxu1 }
 0x114   : > { %v484_v9 = vpop.f32.mrb[2].mxu1 }
 0x115   : > { %v488_v11 = vpack.c.bf16 %v484_v9, %v481_v7  ;;  %v1007_v12 = vpop.f32.mrb[3].mxu1 }
 0x117   : > { %1013 = vmatmul.mubr.msk.bf16.vlgmr.msra.gmra.mrb[4].mxu1 %vm505_vm3, %v488_v11  ;;  %v554_v14 = vrot.slane %v488_v11, 4 }
 0x118   : > { %1017 = vmatpush3.bf16.msra.mxu1 %v1103_v10  ;;  %1020 = vmatprep.mubr.msk.bf16.mxu1 %vm1221_vm0, %v1220_v0 }
 0x119   : > { %1018 = vmatprep.subr.bf16.mxu1 %v1220_v0 }
 0x11c   : > { %1019 = vmatpush3.bf16.msra.mxu1 %v1104_v13 }
 0x11d   : > { %1024 = vmatprep.subr.bf16.mxu1 %v1220_v0 }
 0x11f   : > { %1021 = vmatmul.mubr.msk.bf16.vlgmr.msra.gmra.mrb[8].mxu1 %vm505_vm3, %v554_v14 }
 0x120   : > { %1028 = vmatprep.mubr.msk.bf16.mxu1 %vm1221_vm0, %v1220_v0  ;;  %1025 = vmatpush3.bf16.msra.mxu1 %v1105_v31 }
 0x121   : > { %1026 = vmatprep.subr.bf16.mxu1 %v1220_v0 }
 0x124   : > { %1027 = vmatpush3.bf16.msra.mxu1 %v1106_v32 }
 0x1ea   : > { %v543_v15 = vpop.f32.mrb[4].mxu1 }
 0x1eb   : > { %v1014_v16 = vpop.f32.mrb[5].mxu1 }
 0x1ec   : > { %v546_v17 = vpop.f32.mrb[6].mxu1 }
 0x1ed   : > { %v1015_v18 = vpop.f32.mrb[7].mxu1 }
 0x1f2   : > { %v604_v19 = vpop.f32.mrb[8].mxu1 }
 0x1f3   : > { %v610_v20 = vsub.f32 %v543_v15, %v604_v19  ;;  %v1022_v21 = vpop.f32.mrb[9].mxu1 }
 0x1f4   : > { %v607_v22 = vpop.f32.mrb[10].mxu1 }
 0x1f5   : > { %v1023_v23 = vpop.f32.mrb[11].mxu1  ;;  %v611_v24 = vadd.f32 %v610_v20, %v430_v1  ;;  %v976_v20 = vld [vmem:[%s1559_s10] ss:$0 sm:$0xff] }
 0x1f6   : > { %v977_v22 = vld [vmem:[%s1560_s11] ss:$0 sm:$0xff] }
 0x1f7   : > { %v614_v25 = vsel %vm505_vm3, %v611_v24, 0.0 }
 0x1f8   : > { %615 = vadd.xlane.f32.xlu0 %v614_v25 }
 0x285   : > { %v616_v26 = vpop.xlane.xlu0 %615 }
 0x286   : > { %v618_v27 = vmul.f32 0.03125, %v616_v26 }
 0x288   : > { %v619_v28 = vsub.f32 %v611_v24, %v618_v27 }
 0x28a   : > { %v620_v29 = vmul.f32 %v619_v28, %v619_v28 }
 0x28c   : > { %v621_v30 = vsel %vm505_vm3, %v620_v29, 0.0 }
 0x28d   : > { %622 = vadd.xlane.f32.xlu0 %v621_v30 }
 0x31a   : > { %v623_v34 = vpop.xlane.xlu0 %622 }
 0x31b   : > { %v624_v35 = vmul.f32 0.03125, %v623_v34 }
 0x31d   : > { %v625_v36 = vadd.f32 1e-12, %v624_v35 }
 0x31f   : > { %1115 = vrsqrt.f32 %v625_v36 }
 0x329   : > { %v1116_v37 = vpop.eup %1115 }
 0x32a   : > { %v627_v39 = vmul.f32 %v1116_v37, %v619_v28 }
 0x32c   : > { %v634_v41 = vmul.f32 %v961_v38, %v627_v39 }
 0x32e   : > { %v641_v42 = vadd.f32 %v962_v40, %v634_v41 }
 0x330   : > { %v642_v43 = vpack.c.bf16 %v641_v42, %v641_v42 }
 0x332   : > { %1029 = vmatmul.mubr.msk.bf16.vlgmr.msra.gmra.mrb[12].mxu1 %vm505_vm3, %v642_v43 }
 0x405   : > { %v703_v52 = vpop.f32.mrb[12].mxu1 }
 0x406   : > { %v704_v53 = vadd.f32 %v963_v51, %v703_v52  ;;  %v1030_v54 = vpop.f32.mrb[13].mxu1 }
 0x407   : > { %v706_v55 = vpop.f32.mrb[14].mxu1 }
 0x408   : > { %v710_v56 = vmul.f32 0.044715, %v704_v53  ;;  %v1031_v57 = vpop.f32.mrb[15].mxu1  ;;  %v709_v63 = vmul.f32 0.5, %v704_v53 }
 0x40a   : > { %v711_v58 = vmul.f32 %v710_v56, %v704_v53 }
 0x40c   : > { %v712_v59 = vmul.f32 %v711_v58, %v704_v53 }
 0x40e   : > { %v713_v60 = vadd.f32 %v712_v59, %v704_v53 }
 0x410   : > { %v714_v61 = vmul.f32 0.7978846, %v713_v60 }
 0x412   : > { %1117 = vtanh.f32 %v714_v61 }
 0x41c   : > { %v1118_v62 = vpop.eup %1117 }
 0x41d   : > { %v716_v1 = vadd.f32 1.0, %v1118_v62 }
 0x41f   : > { %v717_v0 = vmul.f32 %v716_v1, %v709_v63 }
 0x421   : > { %v718_v2 = vpack.c.bf16 %v717_v0, %v717_v0 }
 0x423   : > { %1049 = vmatmul.mubr.bf16.vlgmr.msra.gmra.mrb[0].mxu0 %v718_v2 }
 0x4f6   : > { %v824_v4 = vpop.f32.mrb[0].mxu0 }
 0x4f7   : > { %v825_v5 = vadd.f32 %v967_v3, %v824_v4  ;;  %v1050_v6 = vpop.f32.mrb[1].mxu0 }
 0x4f8   : > { %v827_v7 = vpop.f32.mrb[2].mxu0 }
 0x4f9   : > { %v1051_v8 = vpop.f32.mrb[3].mxu0  ;;  %v830_v9 = vadd.f32 %v825_v5, %v641_v42 }
 0x4fb   : > { %v833_v10 = vsel %vm505_vm3, %v830_v9, 0.0 }
 0x4fc   : > { %834 = vadd.xlane.f32.xlu1 %v833_v10 }
 0x589   : > { %v835_v11 = vpop.xlane.xlu1 %834 }
 0x58a   : > { %v836_v12 = vmul.f32 0.03125, %v835_v11 }
 0x58c   : > { %v837_v13 = vsub.f32 %v830_v9, %v836_v12 }
 0x58e   : > { %v838_v14 = vmul.f32 %v837_v13, %v837_v13 }
 0x590   : > { %v839_v15 = vsel %vm505_vm3, %v838_v14, 0.0 }
 0x591   : > { %840 = vadd.xlane.f32.xlu1 %v839_v15 }
 0x61e   : > { %v841_v16 = vpop.xlane.xlu1 %840 }
 0x61f   : > { %v842_v17 = vmul.f32 0.03125, %v841_v16 }
 0x621   : > { %v843_v18 = vadd.f32 1e-12, %v842_v17 }
 0x623   : > { %1119 = vrsqrt.f32 %v843_v18 }
 0x62d   : > { %v1120_v19 = vpop.eup %1119 }
 0x62e   : > { %v845_v21 = vmul.f32 %v1120_v19, %v837_v13 }
 0x630   : > { %v852_v23 = vmul.f32 %v976_v20, %v845_v21 }
 0x632   : > { %v859_v24 = vadd.f32 %v977_v22, %v852_v23 }
 0x634   : > { %860 = vst.msk [vmem:[%s428_s20] sm:$0xff] %vm505_vm3, %v859_v24 }
 0x635   : > { %1164 = shalt.err (!%p1161_p4)
}
 0x636   : > { %s1165_s18 = scalar_lea.hbm %s1504_s23, 128  ;;  %s1169_s20 = scalar_lea.hbm %s1561_s12, 256 }
 0x637   : > { %p1166_p5 = scmp.ne.s32.totalorder %s1504_s23, %s1165_s18  ;;  %p1170_p0 = scmp.lt.u32.totalorder %s1504_s23, %s1561_s12 }
 0x638   : > { %p1171_p1 = scmp.lt.u32.totalorder %s1169_s20, %s1165_s18  ;;  %p1173_p6 = scmp.lt.u32.totalorder %s1165_s18, %s1504_s23 }
 0x639   : > { %p1167_p8 = pnand %p1166_p5, %p1576_p11 }
 0x63a   : > { %p1172_p3 = por %p1171_p1, %p1170_p0 }
 0x63b   : > { %p1168_p9 = pneg %p1167_p8 }
 0x63c   : > { %p1174_p12 = por %p1173_p6, %p1172_p3 }
 0x63e   : > { %p1175_p13 = pnand %p1174_p12, %p1168_p9 }
 0x640   : > { %1178 = shalt.err (!%p1175_p13)
}
 0x641   : > { %1054 = dma.vmem_to_hbm [thread:$0]  (%p1576_p11), %s1506_s17, 128, %s1504_s23, %s862_s26  }
 0x642 PF: > { %s887_s27 = sand.u32 1, %s1205_s21   ;;  %p1577_p7 = scmp.ne.s32.totalorder %s1572_s16, 0 }
 0x643   : > { %p1578_p10 = scmp.ge.s32.totalorder %s1217_s24, 2  ;;  %s888_s25 = scalar_lea.sflag [#allocation4], %s887_s27 }
 0x645   : > { %p1061_p2 = pnand %p1578_p10, %p1577_p7 }
 0x647   : > { %1200 = dma.done.wait (!%p1061_p2), %s888_s25, 128  }
 0x648   : > { %1202 = vsyncadd (!%p1061_p2), %s888_s25, 4294967168  ;;  %s1579_s24 = sld [smem:[#allocation9_spill]]  ;;  %s1580_s28 = sld [smem:[#allocation8_spill]] }
 0x649   : > { %s1581_s23 = sld [smem:[#allocation10_spill]]  ;;  %s1582_s21 = smov %s1209_s22 }
 0x64e   : > { %p25_p4 = scmp.ge.s32.totalorder %s1579_s24, 4   ;;  %s1583_s22 = smov %s1580_s28 }
 0x650   :  { %27 = sbr.rel (!%p25_p4) target bundleno = 5 (0x5), region = 113 }
 0x657   :  { %893 = vsyncpa [#allocation3], 1 }
 0x658   :  { %895 = vsyncpa [#allocation3 + $0x1], 1 }
 0x659   :  { %896 = vsyncpa [#allocation4], 1 }
 0x65a   :  { %898 = vsyncpa [#allocation4 + $0x1], 1 }

// kernel: fnet_encoder.2
= control target key start
LH: loop header
LB: loop body
LE: loop exit
PB: predicated region body
PF: predicated region fallthrough
CT: control target
= control target key end

     0   :  { %s1104_s21 = smov 0   ;;  %s1224_s0 = inlined_call_operand.vmem [shape: f32[2,8,32], index: 0, kind: input, shape index: {}, may-alias: {0,12}]   ;;  %s1225_s1 = inlined_call_operand.vmem [shape: bf16[16,8], index: 1, kind: input, shape index: {}]   ;;  %s1226_s2 = inlined_call_operand.vmem [shape: bf16[32,32], index: 2, kind: input, shape index: {}]   ;;  %s1227_s3 = inlined_call_operand.vmem [shape: bf16[32,32], index: 3, kind: input, shape index: {}]   ;;  %s1228_s4 = inlined_call_operand.vmem [shape: f32[1,32], index: 4, kind: input, shape index: {}]   ;;  %s1229_s5 = inlined_call_operand.vmem [shape: f32[1,32], index: 5, kind: input, shape index: {}]   ;;  %s1230_s6 = inlined_call_operand.vmem [shape: bf16[32,128], index: 6, kind: input, shape index: {}]   ;;  %s1231_s7 = inlined_call_operand.vmem [shape: f32[1,128], index: 7, kind: input, shape index: {}]   ;;  %s1232_s8 = inlined_call_operand.vmem [shape: bf16[128,32], index: 8, kind: input, shape index: {}]   ;;  %s1233_s9 = inlined_call_operand.vmem [shape: f32[1,32], index: 9, kind: input, shape index: {}]   ;;  %s1234_s10 = inlined_call_operand.vmem [shape: f32[1,32], index: 10, kind: input, shape index: {}]   ;;  %s1235_s11 = inlined_call_operand.vmem [shape: f32[1,32], index: 11, kind: input, shape index: {}]   ;;  %s1236_s12 = inlined_call_operand.vmem [shape: f32[2,8,32], index: 12, kind: output, shape index: {}, may-alias: {0,12}]  }
   0x1 LB: > { %s894_s22 = sadd.s32 4294967295, %s1035_s21   ;;  %p898_p0 = scmp.ge.s32.totalorder %s1035_s21, 1  ;;  %s1035_s21 = sphi %s1104_s21, %s22_s21  }
   0x2   : > { %p361_p1 = scmp.lt.s32.totalorder %s1035_s21, 3 }
   0x4   : > { %p362_p2 = pnand %p898_p0, %p361_p1 }
   0x5   : > { %p401_p3 = scmp.lt.s32.totalorder (!%p362_p2), %s894_s22, 1  ;;  %v1037_v0 = vmov (!%p362_p2), 0.0   ;;  %vm1038_vm0 = vmmov (!%p362_p2), 0   ;;  %vm423_vm1 = vcmask (!%p362_p2), 1043456   ;;  %vm419_vm2 = vcmask (!%p362_p2), 64512   ;;  %v1008_v3 = vld [vmem:[%s1225_s1] sm:$0xff] (!%p362_p2)  }
   0x6   : > { %365 = sbr.rel (%p362_p2) target bundleno = 1549 (0x60d), region = 68  ;;  %948 = vmatprep.subr.bf16.mxu1 (!%p362_p2), %v1037_v0  ;;  %950 = vmatprep.mubr.msk.bf16.mxu1 (!%p362_p2), %vm1038_vm0, %v1037_v0  ;;  %v1009_v5 = vld [vmem:[%s1226_s2] sm:$0xff] (!%p362_p2)   ;;  %v1010_v6 = vld [vmem:[%s1226_s2 + $0x8] sm:$0xff] (!%p362_p2)   ;;  %vm485_vm3 = vcmask (!%p362_p2), 261120   ;;  %v1017_v45 = vld [vmem:[%s1232_s8 + $0x10] sm:$0xff] (!%p362_p2)  }
   0x7   : > { %978 = vmatprep.subr.bf16.mxu0 (!%p362_p2), %v1037_v0  ;;  %994 = vmatprep.mubr.msk.bf16.mxu0 (!%p362_p2), %vm1038_vm0, %v1037_v0  ;;  %v1011_v10 = vld [vmem:[%s1227_s3] sm:$0xff] (!%p362_p2)   ;;  %v1012_v13 = vld [vmem:[%s1227_s3 + $0x8] sm:$0xff] (!%p362_p2)   ;;  %v1018_v46 = vld [vmem:[%s1232_s8 + $0x18] sm:$0xff] (!%p362_p2)  }
   0x8   : > { %v1013_v31 = vld [vmem:[%s1230_s6] sm:$0xff] (!%p362_p2)   ;;  %v1014_v32 = vld [vmem:[%s1230_s6 + $0x8] sm:$0xff] (!%p362_p2)   ;;  %v1021_v49 = vld [vmem:[%s1232_s8 + $0x30] sm:$0xff] (!%p362_p2)  }
   0x9   : > { %v1015_v33 = vld [vmem:[%s1232_s8] sm:$0xff] (!%p362_p2)   ;;  %v1016_v44 = vld [vmem:[%s1232_s8 + $0x8] sm:$0xff] (!%p362_p2)   ;;  %v1022_v50 = vld [vmem:[%s1232_s8 + $0x38] sm:$0xff] (!%p362_p2)  }
   0xa   : > { %979 = vmatpush3.bf16.msra.mxu0 (!%p362_p2), %v1015_v33  ;;  %v909_v38 = vld [vmem:[%s1228_s4] ss:$0 sm:$0xff] (!%p362_p2)  ;;  %v1020_v48 = vld [vmem:[%s1232_s8 + $0x28] sm:$0xff] (!%p362_p2)  }
   0xb   : > { %980 = vmatprep.subr.bf16.mxu0 (!%p362_p2), %v1037_v0  ;;  %v910_v40 = vld [vmem:[%s1229_s5] ss:$0 sm:$0xff] (!%p362_p2) }
   0xc   : > { %v1019_v47 = vld [vmem:[%s1232_s8 + $0x20] sm:$0xff] (!%p362_p2)  }
   0xd   : > { %s1238_s22 = smov (!%p401_p3, %s894_s22), 1  ;;  %v911_v51 = vld [vmem:[%s1231_s7] ss:$0 sm:$0xff] }
   0xe   : > { %s899_s23 = sshll.u32 %s1238_s22, 3  ;;  %981 = vmatpush3.bf16.msra.mxu0 %v1016_v44 }
   0xf   : > { %s404_s26 = scalar_lea.vmem %s1224_s0, %s899_s23  ;;  %982 = vmatprep.subr.bf16.mxu0 %v1037_v0 }
  0x10   : > { %v410_v1 = vld [vmem:[%s404_s26] sm:$0xff]  ;;  %s408_s26 = scalar_lea.vmem %s1236_s12, %s899_s23 }
  0x11   : > { %v411_v2 = vpack.c.bf16 %v410_v1, %v410_v1 }
  0x12   : > { %983 = vmatpush3.bf16.msra.mxu0 %v1017_v45 }
  0x13   : > { %v425_v4 = vsel %vm423_vm1, %v411_v2, 0  ;;  %984 = vmatprep.subr.bf16.mxu0 %v1037_v0 }
  0x14   : > { %949 = vmatpush3.bf16.msra.mxu1 %v425_v4 }
  0x15   : > { %954 = vmatprep.subr.bf16.mxu1 %v1037_v0 }
  0x16   : > { %985 = vmatpush3.bf16.msra.mxu0 %v1018_v46 }
  0x17   : > { %951 = vmatmul.mubr.msk.bf16.vlgmr.msra.gmra.mrb[0].mxu1 %vm419_vm2, %v1008_v3  ;;  %986 = vmatprep.subr.bf16.mxu0 %v1037_v0  ;;  %v915_v3 = vld [vmem:[%s1233_s9] ss:$0 sm:$0xff] }
  0x18   : > { %955 = vmatpush3.bf16.msra.mxu1 %v1009_v5  ;;  %958 = vmatprep.mubr.msk.bf16.mxu1 %vm1038_vm0, %v1037_v0 }
  0x19   : > { %956 = vmatprep.subr.bf16.mxu1 %v1037_v0 }
  0x1a   : > { %987 = vmatpush3.bf16.msra.mxu0 %v1019_v47 }
  0x1b   : > { %988 = vmatprep.subr.bf16.mxu0 %v1037_v0 }
  0x1c   : > { %957 = vmatpush3.bf16.msra.mxu1 %v1010_v6 }
  0x1d   : > { %962 = vmatprep.subr.bf16.mxu1 %v1037_v0 }
  0x1e   : > { %989 = vmatpush3.bf16.msra.mxu0 %v1020_v48 }
  0x1f   : > { %990 = vmatprep.subr.bf16.mxu0 %v1037_v0 }
  0x22   : > { %991 = vmatpush3.bf16.msra.mxu0 %v1021_v49 }
  0x23   : > { %992 = vmatprep.subr.bf16.mxu0 %v1037_v0 }
  0x26   : > { %993 = vmatpush3.bf16.msra.mxu0 %v1022_v50 }
  0xea   : > { %v461_v7 = vpop.f32.mrb[0].mxu1 }
  0xeb   : > { %v952_v8 = vpop.f32.mrb[1].mxu1 }
  0xec   : > { %v464_v9 = vpop.f32.mrb[2].mxu1 }
  0xed   : > { %v468_v11 = vpack.c.bf16 %v464_v9, %v461_v7  ;;  %v953_v12 = vpop.f32.mrb[3].mxu1 }
  0xef   : > { %959 = vmatmul.mubr.msk.bf16.vlgmr.msra.gmra.mrb[4].mxu1 %vm485_vm3, %v468_v11  ;;  %v534_v14 = vrot.slane %v468_v11, 4 }
  0xf0   : > { %963 = vmatpush3.bf16.msra.mxu1 %v1011_v10  ;;  %966 = vmatprep.mubr.msk.bf16.mxu1 %vm1038_vm0, %v1037_v0 }
  0xf1   : > { %964 = vmatprep.subr.bf16.mxu1 %v1037_v0 }
  0xf4   : > { %965 = vmatpush3.bf16.msra.mxu1 %v1012_v13 }
  0xf5   : > { %970 = vmatprep.subr.bf16.mxu1 %v1037_v0 }
  0xf7   : > { %967 = vmatmul.mubr.msk.bf16.vlgmr.msra.gmra.mrb[8].mxu1 %vm485_vm3, %v534_v14 }
  0xf8   : > { %974 = vmatprep.mubr.msk.bf16.mxu1 %vm1038_vm0, %v1037_v0  ;;  %971 = vmatpush3.bf16.msra.mxu1 %v1013_v31 }
  0xf9   : > { %972 = vmatprep.subr.bf16.mxu1 %v1037_v0 }
  0xfc   : > { %973 = vmatpush3.bf16.msra.mxu1 %v1014_v32 }
 0x1c2   : > { %v523_v15 = vpop.f32.mrb[4].mxu1 }
 0x1c3   : > { %v960_v16 = vpop.f32.mrb[5].mxu1 }
 0x1c4   : > { %v526_v17 = vpop.f32.mrb[6].mxu1 }
 0x1c5   : > { %v961_v18 = vpop.f32.mrb[7].mxu1 }
 0x1ca   : > { %v584_v19 = vpop.f32.mrb[8].mxu1 }
 0x1cb   : > { %v590_v20 = vsub.f32 %v523_v15, %v584_v19  ;;  %v968_v21 = vpop.f32.mrb[9].mxu1 }
 0x1cc   : > { %v587_v22 = vpop.f32.mrb[10].mxu1 }
 0x1cd   : > { %v969_v23 = vpop.f32.mrb[11].mxu1  ;;  %v591_v24 = vadd.f32 %v590_v20, %v410_v1  ;;  %v924_v20 = vld [vmem:[%s1234_s10] ss:$0 sm:$0xff] }
 0x1ce   : > { %v925_v22 = vld [vmem:[%s1235_s11] ss:$0 sm:$0xff] }
 0x1cf   : > { %v594_v25 = vsel %vm485_vm3, %v591_v24, 0.0 }
 0x1d0   : > { %595 = vadd.xlane.f32.xlu0 %v594_v25 }
 0x25d   : > { %v596_v26 = vpop.xlane.xlu0 %595 }
 0x25e   : > { %v598_v27 = vmul.f32 0.03125, %v596_v26 }
 0x260   : > { %v599_v28 = vsub.f32 %v591_v24, %v598_v27 }
 0x262   : > { %v600_v29 = vmul.f32 %v599_v28, %v599_v28 }
 0x264   : > { %v601_v30 = vsel %vm485_vm3, %v600_v29, 0.0 }
 0x265   : > { %602 = vadd.xlane.f32.xlu0 %v601_v30 }
 0x2f2   : > { %v603_v34 = vpop.xlane.xlu0 %602 }
 0x2f3   : > { %v604_v35 = vmul.f32 0.03125, %v603_v34 }
 0x2f5   : > { %v605_v36 = vadd.f32 1e-12, %v604_v35 }
 0x2f7   : > { %1023 = vrsqrt.f32 %v605_v36 }
 0x301   : > { %v1024_v37 = vpop.eup %1023 }
 0x302   : > { %v607_v39 = vmul.f32 %v1024_v37, %v599_v28 }
 0x304   : > { %v614_v41 = vmul.f32 %v909_v38, %v607_v39 }
 0x306   : > { %v621_v42 = vadd.f32 %v910_v40, %v614_v41 }
 0x308   : > { %v622_v43 = vpack.c.bf16 %v621_v42, %v621_v42 }
 0x30a   : > { %975 = vmatmul.mubr.msk.bf16.vlgmr.msra.gmra.mrb[12].mxu1 %vm485_vm3, %v622_v43 }
 0x3dd   : > { %v683_v52 = vpop.f32.mrb[12].mxu1 }
 0x3de   : > { %v684_v53 = vadd.f32 %v911_v51, %v683_v52  ;;  %v976_v54 = vpop.f32.mrb[13].mxu1 }
 0x3df   : > { %v686_v55 = vpop.f32.mrb[14].mxu1 }
 0x3e0   : > { %v690_v56 = vmul.f32 0.044715, %v684_v53  ;;  %v977_v57 = vpop.f32.mrb[15].mxu1  ;;  %v689_v63 = vmul.f32 0.5, %v684_v53 }
 0x3e2   : > { %v691_v58 = vmul.f32 %v690_v56, %v684_v53 }
 0x3e4   : > { %v692_v59 = vmul.f32 %v691_v58, %v684_v53 }
 0x3e6   : > { %v693_v60 = vadd.f32 %v692_v59, %v684_v53 }
 0x3e8   : > { %v694_v61 = vmul.f32 0.7978846, %v693_v60 }
 0x3ea   : > { %1025 = vtanh.f32 %v694_v61 }
 0x3f4   : > { %v1026_v62 = vpop.eup %1025 }
 0x3f5   : > { %v696_v1 = vadd.f32 1.0, %v1026_v62 }
 0x3f7   : > { %v697_v0 = vmul.f32 %v696_v1, %v689_v63 }
 0x3f9   : > { %v698_v2 = vpack.c.bf16 %v697_v0, %v697_v0 }
 0x3fb   : > { %995 = vmatmul.mubr.bf16.vlgmr.msra.gmra.mrb[0].mxu0 %v698_v2 }
 0x4ce   : > { %v804_v4 = vpop.f32.mrb[0].mxu0 }
 0x4cf   : > { %v805_v5 = vadd.f32 %v915_v3, %v804_v4  ;;  %v996_v6 = vpop.f32.mrb[1].mxu0 }
 0x4d0   : > { %v807_v7 = vpop.f32.mrb[2].mxu0 }
 0x4d1   : > { %v997_v8 = vpop.f32.mrb[3].mxu0  ;;  %v810_v9 = vadd.f32 %v805_v5, %v621_v42 }
 0x4d3   : > { %v813_v10 = vsel %vm485_vm3, %v810_v9, 0.0 }
 0x4d4   : > { %814 = vadd.xlane.f32.xlu1 %v813_v10 }
 0x561   : > { %v815_v11 = vpop.xlane.xlu1 %814 }
 0x562   : > { %v816_v12 = vmul.f32 0.03125, %v815_v11 }
 0x564   : > { %v817_v13 = vsub.f32 %v810_v9, %v816_v12 }
 0x566   : > { %v818_v14 = vmul.f32 %v817_v13, %v817_v13 }
 0x568   : > { %v819_v15 = vsel %vm485_vm3, %v818_v14, 0.0 }
 0x569   : > { %820 = vadd.xlane.f32.xlu1 %v819_v15 }
 0x5f6   : > { %v821_v16 = vpop.xlane.xlu1 %820 }
 0x5f7   : > { %v822_v17 = vmul.f32 0.03125, %v821_v16 }
 0x5f9   : > { %v823_v18 = vadd.f32 1e-12, %v822_v17 }
 0x5fb   : > { %1027 = vrsqrt.f32 %v823_v18 }
 0x605   : > { %v1028_v19 = vpop.eup %1027 }
 0x606   : > { %v825_v21 = vmul.f32 %v1028_v19, %v817_v13 }
 0x608   : > { %v832_v23 = vmul.f32 %v924_v20, %v825_v21 }
 0x60a   : > { %v839_v24 = vadd.f32 %v925_v22, %v832_v23 }
 0x60c   : > { %840 = vst.msk [vmem:[%s408_s26] sm:$0xff] %vm485_vm3, %v839_v24 }
 0x60d PF: > { %s22_s21 = sadd.s32 1, %s1035_s21  }
 0x60e   : > { %p19_p4 = scmp.ge.s32.totalorder %s22_s21, 4  }
 0x610   :  { %21 = sbr.rel (!%p19_p4) target bundleno = 1 (0x1), region = 98 }

</bundles_post_ra>
